<compile_context>
chip_gen: v5e
topology: v5e:2x2
jax: 0.10.0
libtpu: 0.0.40
codegen_flags: <defaults>
</compile_context>

<pallas_src>
import jax
import jax.numpy as jnp
from jax.experimental import pallas as pl
from jax.experimental.pallas import tpu as pltpu


def _make_mlp_kernel(num_layers):
    """Fused MLP kernel for `num_layers` Linear layers in transposed layout.

    Ref order: x_t, (w0, b0), (w1, b1), ..., out_t.
      x_t : (in_dim, block_batch)         features on sublanes, batch on lanes
      w_i : (out_i, in_i)                 (PyTorch nn.Linear weight layout)
      b_i : (out_i, 1)
      out : (out_dim, block_batch)        lane-dense
    ReLU after every layer except the last (matches the PyTorch module).
    """

    def kernel(*refs):
        x_ref = refs[0]
        o_ref = refs[-1]
        # Cast to f32 in-kernel so x may be stored in bf16 in HBM on v5e/v6e.
        h = x_ref[...].astype(jnp.float32)
        for i in range(num_layers):
            w = refs[1 + 2 * i][...]            # (out_i, in_i)
            b = refs[2 + 2 * i][...]            # (out_i, 1)
            # MXU matmul, f32 accumulation.  (We don't chase MXU utilization:
            # with K<=32 features the kernel is HBM-bound; the big streamed
            # dimension is block_batch on the lane axis.)
            h = jnp.dot(w, h, preferred_element_type=jnp.float32) + b
            if i < num_layers - 1:
                h = jnp.maximum(h, 0.0)         # ReLU on hidden layers only
        o_ref[...] = h.astype(o_ref.dtype)

    return kernel


def flight_mlp_forward(x, params, *, block_batch=2048):
    """FlightMLP forward pass as one fused Pallas kernel.

    x:      (batch, 31) float32 (or bfloat16)
    params: list of (w, b) with w shape (out_i, in_i), b shape (out_i, 1)
            — i.e. the native PyTorch nn.Linear parameter layout.
    Returns (batch, 1) in x.dtype.
    """
    batch, in_dim = x.shape
    num_layers = len(params)
    out_dim = params[-1][0].shape[0]

    # Batch lives on the lane axis -> tile must be a multiple of 128 lanes.
    block_batch = max(128, (int(block_batch) // 128) * 128)
    # Don't over-pad tiny batches to a huge tile.
    min_padded = -(-batch // 128) * 128
    block_batch = min(block_batch, min_padded)
    grid_b = -(-batch // block_batch)           # cdiv -> handles ragged batches
    padded_batch = grid_b * block_batch

    # Transposed, zero-padded activation slab (31, padded_batch).
    x_t = x.T
    if padded_batch != batch:
        x_t = jnp.pad(x_t, ((0, 0), (0, padded_batch - batch)))

    kernel = _make_mlp_kernel(num_layers)

    in_specs = [pl.BlockSpec((in_dim, block_batch), lambda i: (0, i))]
    flat_params = []
    for (w, b) in params:
        in_specs.append(pl.BlockSpec(w.shape, lambda i: (0, 0)))
        in_specs.append(pl.BlockSpec(b.shape, lambda i: (0, 0)))
        flat_params.extend([w, b])

    out_specs = pl.BlockSpec((out_dim, block_batch), lambda i: (0, i))

    # Advisory cost estimate for XLA's scheduler.
    dims = [in_dim] + [w.shape[0] for (w, _) in params]
    flops = 2 * padded_batch * sum(dims[i] * dims[i + 1]
                                   for i in range(num_layers))
    itemsize = jnp.dtype(x.dtype).itemsize
    bytes_accessed = (in_dim * padded_batch * itemsize
                      + sum(int(w.size) * 4 + int(b.size) * 4
                            for (w, b) in params)
                      + out_dim * padded_batch * itemsize)
    cost = pl.CostEstimate(flops=flops, transcendentals=0,
                           bytes_accessed=bytes_accessed)

    out_t = pl.pallas_call(
        kernel,
        out_shape=jax.ShapeDtypeStruct((out_dim, padded_batch), x.dtype),
        grid_spec=pltpu.PrefetchScalarGridSpec(
            num_scalar_prefetch=0,
            grid=(grid_b,),
            in_specs=in_specs,
            out_specs=out_specs,
        ),
        compiler_params=pltpu.CompilerParams(
            dimension_semantics=("parallel",),
        ),
        cost_estimate=cost,
    )(x_t, *flat_params)

    # Back to the PyTorch-facing (batch, 1) layout (layout plumbing only).
    return out_t[:, :batch].T


def init_flight_mlp_params(key, layer_sizes, input_size=31):
    """Deterministic init matching nn.Linear's U(-1/sqrt(fan_in), 1/sqrt(fan_in)).

    Returns weights in the native (out, in) layout and biases as (out, 1).
    """
    dims = [input_size] + list(layer_sizes) + [1]
    params = []
    for i in range(len(dims) - 1):
        fan_in, fan_out = dims[i], dims[i + 1]
        key, kw, kb = jax.random.split(key, 3)
        bound = 1.0 / (fan_in ** 0.5)
        w = jax.random.uniform(kw, (fan_out, fan_in), jnp.float32,
                               minval=-bound, maxval=bound)
        b = jax.random.uniform(kb, (fan_out, 1), jnp.float32,
                               minval=-bound, maxval=bound)
        params.append((w, b))
    return params


def flight_mlp_reference(x, params):
    """Pure-JAX reference of the same forward pass."""
    h = x
    n = len(params)
    for i, (w, b) in enumerate(params):
        h = h @ w.T + b.reshape(1, -1)
        if i < n - 1:
            h = jnp.maximum(h, 0.0)
    return h


if __name__ == "__main__":
    key = jax.random.PRNGKey(0)
    layer_sizes = [32, 32]          # hidden layer sizes
    input_size = 31

    params = init_flight_mlp_params(key, layer_sizes, input_size=input_size)

    # Small smoke test (single-tile grid).
    key, kx = jax.random.split(key)
    x_small = jax.random.normal(kx, (8, input_size), jnp.float32)
    out_small = jax.block_until_ready(flight_mlp_forward(x_small, params))
    ref_small = flight_mlp_reference(x_small, params)
    assert out_small.shape == (8, 1), out_small.shape
    assert jnp.allclose(out_small, ref_small, atol=1e-5, rtol=1e-5), \
        "mismatch vs reference (small batch)"

    # Ragged batch with a multi-step parallel grid (exercises the batch tiling,
    # zero-padding and the pipelined x DMA path).
    key, kx2 = jax.random.split(key)
    x_big = jax.random.normal(kx2, (300, input_size), jnp.float32)
    out_big = jax.block_until_ready(
        flight_mlp_forward(x_big, params, block_batch=128))
    ref_big = flight_mlp_reference(x_big, params)
    assert out_big.shape == (300, 1), out_big.shape
    assert jnp.allclose(out_big, ref_big, atol=1e-5, rtol=1e-5), \
        "mismatch vs reference (ragged batch)"

    print("KERNEL_OK")
</pallas_src>

<mosaic_0001>
module attributes {stable_mosaic.version = 11 : i64} {
  func.func @kernel(%arg0: i32, %arg1: memref<31x128xf32, #tpu.memory_space<vmem>>, %arg2: memref<32x31xf32, #tpu.memory_space<vmem>>, %arg3: memref<32x1xf32, #tpu.memory_space<vmem>>, %arg4: memref<32x32xf32, #tpu.memory_space<vmem>>, %arg5: memref<32x1xf32, #tpu.memory_space<vmem>>, %arg6: memref<1x32xf32, #tpu.memory_space<vmem>>, %arg7: memref<1x1xf32, #tpu.memory_space<vmem>>, %arg8: memref<1x128xf32, #tpu.memory_space<vmem>>) attributes {dimension_semantics = [#tpu.dimension_semantics<parallel>], iteration_bounds = array<i64: 1>, scalar_prefetch = 0 : i64, scratch_operands = 0 : i64, tpu.core_type = #tpu.core_type<tc>, window_params = [{transform_indices = @transform_0, window_bounds = array<i64: 31, 128>}, {pipeline_mode = #tpu.pipeline_mode<synchronous>, transform_indices = @transform_1, window_bounds = array<i64: 32, 31>}, {pipeline_mode = #tpu.pipeline_mode<synchronous>, transform_indices = @transform_2, window_bounds = array<i64: 32, 1>}, {pipeline_mode = #tpu.pipeline_mode<synchronous>, transform_indices = @transform_3, window_bounds = array<i64: 32, 32>}, {pipeline_mode = #tpu.pipeline_mode<synchronous>, transform_indices = @transform_4, window_bounds = array<i64: 32, 1>}, {pipeline_mode = #tpu.pipeline_mode<synchronous>, transform_indices = @transform_5, window_bounds = array<i64: 1, 32>}, {pipeline_mode = #tpu.pipeline_mode<synchronous>, transform_indices = @transform_6, window_bounds = array<i64: 1, 1>}, {transform_indices = @transform_7, window_bounds = array<i64: 1, 128>}]} {
    %c0 = arith.constant 0 : index
    %c0_0 = arith.constant 0 : index
    %0 = vector.load %arg1[%c0, %c0_0] : memref<31x128xf32, #tpu.memory_space<vmem>>, vector<31x128xf32>
    %c0_1 = arith.constant 0 : index
    %c0_2 = arith.constant 0 : index
    %1 = vector.load %arg2[%c0_1, %c0_2] : memref<32x31xf32, #tpu.memory_space<vmem>>, vector<32x31xf32>
    %c0_3 = arith.constant 0 : index
    %c0_4 = arith.constant 0 : index
    %2 = vector.load %arg3[%c0_3, %c0_4] : memref<32x1xf32, #tpu.memory_space<vmem>>, vector<32x1xf32>
    %cst = arith.constant dense<0.000000e+00> : vector<32x128xf32>
    %3 = tpu.matmul %1, %0, %cst {dimension_numbers = #tpu.dot_dimension_numbers<[1], [0], [0], [1], [0, 0, 1, 1], [], []>} : vector<32x31xf32>, vector<31x128xf32>, vector<32x128xf32> -> vector<32x128xf32>
    %4 = vector.broadcast %2 : vector<32x1xf32> to vector<32x128xf32>
    %5 = arith.addf %3, %4 : vector<32x128xf32>
    %cst_5 = arith.constant 0.000000e+00 : f32
    %6 = vector.broadcast %cst_5 : f32 to vector<32x128xf32>
    %7 = arith.maximumf %5, %6 : vector<32x128xf32>
    %c0_6 = arith.constant 0 : index
    %c0_7 = arith.constant 0 : index
    %8 = vector.load %arg4[%c0_6, %c0_7] : memref<32x32xf32, #tpu.memory_space<vmem>>, vector<32x32xf32>
    %c0_8 = arith.constant 0 : index
    %c0_9 = arith.constant 0 : index
    %9 = vector.load %arg5[%c0_8, %c0_9] : memref<32x1xf32, #tpu.memory_space<vmem>>, vector<32x1xf32>
    %cst_10 = arith.constant dense<0.000000e+00> : vector<32x128xf32>
    %10 = tpu.matmul %8, %7, %cst_10 {dimension_numbers = #tpu.dot_dimension_numbers<[1], [0], [0], [1], [0, 0, 1, 1], [], []>} : vector<32x32xf32>, vector<32x128xf32>, vector<32x128xf32> -> vector<32x128xf32>
    %11 = vector.broadcast %9 : vector<32x1xf32> to vector<32x128xf32>
    %12 = arith.addf %10, %11 : vector<32x128xf32>
    %cst_11 = arith.constant 0.000000e+00 : f32
    %13 = vector.broadcast %cst_11 : f32 to vector<32x128xf32>
    %14 = arith.maximumf %12, %13 : vector<32x128xf32>
    %c0_12 = arith.constant 0 : index
    %c0_13 = arith.constant 0 : index
    %15 = vector.load %arg6[%c0_12, %c0_13] : memref<1x32xf32, #tpu.memory_space<vmem>>, vector<1x32xf32>
    %c0_14 = arith.constant 0 : index
    %c0_15 = arith.constant 0 : index
    %16 = vector.load %arg7[%c0_14, %c0_15] : memref<1x1xf32, #tpu.memory_space<vmem>>, vector<1x1xf32>
    %cst_16 = arith.constant dense<0.000000e+00> : vector<1x128xf32>
    %17 = tpu.matmul %15, %14, %cst_16 {dimension_numbers = #tpu.dot_dimension_numbers<[1], [0], [0], [1], [0, 0, 1, 1], [], []>} : vector<1x32xf32>, vector<32x128xf32>, vector<1x128xf32> -> vector<1x128xf32>
    %18 = vector.broadcast %16 : vector<1x1xf32> to vector<1x128xf32>
    %19 = arith.addf %17, %18 : vector<1x128xf32>
    %c0_17 = arith.constant 0 : index
    %c0_18 = arith.constant 0 : index
    %20 = vector.load %arg8[%c0_17, %c0_18] : memref<1x128xf32, #tpu.memory_space<vmem>>, vector<1x128xf32>
    tpu.vector_store %arg8[%c0_17, %c0_18], %19 {strides = array<i32>} : memref<1x128xf32, #tpu.memory_space<vmem>>, vector<1x128xf32>,
    return
  }
  func.func @transform_0(%arg0: i32) -> (i32, i32) {
    %c0_i32 = arith.constant 0 : i32
    %c0_i32_0 = arith.constant 0 : i32
    return %c0_i32, %arg0 : i32, i32
  }
  func.func @transform_1(%arg0: i32) -> (i32, i32) {
    %c0_i32 = arith.constant 0 : i32
    %c0_i32_0 = arith.constant 0 : i32
    %c0_i32_1 = arith.constant 0 : i32
    return %c0_i32, %c0_i32_0 : i32, i32
  }
  func.func @transform_2(%arg0: i32) -> (i32, i32) {
    %c0_i32 = arith.constant 0 : i32
    %c0_i32_0 = arith.constant 0 : i32
    %c0_i32_1 = arith.constant 0 : i32
    return %c0_i32, %c0_i32_0 : i32, i32
  }
  func.func @transform_3(%arg0: i32) -> (i32, i32) {
    %c0_i32 = arith.constant 0 : i32
    %c0_i32_0 = arith.constant 0 : i32
    %c0_i32_1 = arith.constant 0 : i32
    return %c0_i32, %c0_i32_0 : i32, i32
  }
  func.func @transform_4(%arg0: i32) -> (i32, i32) {
    %c0_i32 = arith.constant 0 : i32
    %c0_i32_0 = arith.constant 0 : i32
    %c0_i32_1 = arith.constant 0 : i32
    return %c0_i32, %c0_i32_0 : i32, i32
  }
  func.func @transform_5(%arg0: i32) -> (i32, i32) {
    %c0_i32 = arith.constant 0 : i32
    %c0_i32_0 = arith.constant 0 : i32
    %c0_i32_1 = arith.constant 0 : i32
    return %c0_i32, %c0_i32_0 : i32, i32
  }
  func.func @transform_6(%arg0: i32) -> (i32, i32) {
    %c0_i32 = arith.constant 0 : i32
    %c0_i32_0 = arith.constant 0 : i32
    %c0_i32_1 = arith.constant 0 : i32
    return %c0_i32, %c0_i32_0 : i32, i32
  }
  func.func @transform_7(%arg0: i32) -> (i32, i32) {
    %c0_i32 = arith.constant 0 : i32
    %c0_i32_0 = arith.constant 0 : i32
    return %c0_i32, %arg0 : i32, i32
  }
}

</mosaic_0001>

<bundles_post_ra>
// kernel: tpu_custom_call.1
= control target key start
LH: loop header
LB: loop body
LE: loop exit
PB: predicated region body
PF: predicated region fallthrough
CT: control target
= control target key end

     0   :  { %s442_s0 = inlined_call_operand.vmem [shape: f32[31,128], index: 0, kind: input, shape index: {}]   ;;  %s443_s1 = inlined_call_operand.vmem [shape: f32[32,31], index: 1, kind: input, shape index: {}]   ;;  %s444_s2 = inlined_call_operand.vmem [shape: f32[32,1], index: 2, kind: input, shape index: {}]   ;;  %s445_s3 = inlined_call_operand.hbm [shape: f32[32,32], index: 3, kind: input, shape index: {}]   ;;  %s446_s4 = inlined_call_operand.vmem [shape: f32[32,1], index: 4, kind: input, shape index: {}]   ;;  %s447_s5 = inlined_call_operand.vmem [shape: f32[1,32], index: 5, kind: input, shape index: {}]   ;;  %s448_s6 = inlined_call_operand.<no memory space> [shape: f32[1,1], index: 6, kind: input, shape index: {}]   ;;  %s449_s7 = inlined_call_operand.hbm [shape: f32[1,128], index: 7, kind: output, shape index: {}]  }
   0x1   :  { %v12_v0 = vstv %s448_s6 }
   0x2   :  { %13 = vst [vmem:[#allocation2] sm:$0x1] %v12_v0 }
   0x3   :  { %14 = vsyncpa [#allocation4], 0 }
   0x4   :  { %15 = vsyncpa [#allocation5], 0  ;;  %s26_s28 = sshll.u32 %s445_s3, 4  ;;  %s328_s29 = smov [#allocation3]   ;;  %s27_s28 = int_to_ptr.hbm [resolvable:$true] %s26_s28 }
   0x5   :  { %s28_s30 = sshll.u32 %s328_s29, 4  ;;  %s329_s8 = smov 128   ;;  %s29_s30 = int_to_ptr.vmem [resolvable:$true] %s28_s30 }
   0x6   :  { %s330_s9 = smov 8  }
   0x7   :  { %34 = dma.hbm_to_vmem [thread:$0]  %s27_s28, 512, %s29_s30, [#allocation4], %s329_s8, %s329_s8, %s330_s9  }
   0x8   :  { %324 = dma.done.wait [#allocation4], 512  }
   0x9   :  { %325 = vsyncadd [#allocation4], 4294966784  ;;  %v331_v1 = vmov 0   ;;  %vm90_vm0 = vcmask 1046528   ;;  %v48_v2 = vld [vmem:[%s442_s0 + $0x18] sm:$0x7f] }
   0xa   :  { %273 = vset.pattern.permute.xlu0 %v331_v1  ;;  %274 = vset.pattern.permute.xlu1 %v331_v1  ;;  %v47_v3 = vld [vmem:[%s442_s0 + $0x10] sm:$0xff]  ;;  %v46_v4 = vld [vmem:[%s442_s0 + $0x8] sm:$0xff]  ;;  %v56_v5 = vld [vmem:[%s444_s2 + $0x18] sm:$0xff]  ;;  %vm77_vm1 = vcmask 252928   ;;  %vm155_vm2 = vcmask 261120   ;;  %s332_s13 = smov [#allocation6]  }
   0xb   :  { %275 = vset.pattern.permute.xlu2 %v331_v1  ;;  %260 = vmatpush.msk.msra.mxu3 %vm90_vm0, %v48_v2  ;;  %v54_v6 = vld [vmem:[%s444_s2 + $0x8] sm:$0xff]  ;;  %v45_v7 = vld [vmem:[%s442_s0] sm:$0xff]  ;;  %v55_v10 = vld [vmem:[%s444_s2 + $0x10] sm:$0xff]  ;;  %s238_s14 = sshll.u32 %s332_s13, 4  ;;  %s240_s17 = sshll.u32 %s449_s7, 4  ;;  %s239_s14 = int_to_ptr.vmem [resolvable:$true] %s238_s14  ;;  %s241_s17 = int_to_ptr.hbm [resolvable:$true] %s240_s17 }
   0xc   :  { %250 = vmatpush.msk.msra.mxu0 %vm90_vm0, %v48_v2  ;;  %74 = vperm.xlu0 %273, %v56_v5   ;;  %v50_v8 = vld [vmem:[%s443_s1 + $0x8] sm:$0xff]  ;;  %v49_v9 = vld [vmem:[%s443_s1] sm:$0xff]  ;;  %v51_v12 = vld [vmem:[%s443_s1 + $0x10] sm:$0xff] }
   0xd   :  { %261 = vmatpush.msra.mxu3 %v47_v3  ;;  %64 = vperm.xlu1 %274, %v54_v6   ;;  %v53_v11 = vld [vmem:[%s444_s2] sm:$0xff]  ;;  %v132_v13 = vld [vmem:[%s446_s4 + $0x8] sm:$0xff]  ;;  %v52_v15 = vld [vmem:[%s443_s1 + $0x18] sm:$0xff] }
   0xe   :  { %107 = vmatpush.msra.mxu0 %v47_v3  ;;  %v131_v14 = vld [vmem:[%s446_s4] sm:$0xff]  ;;  %v134_v20 = vld [vmem:[%s446_s4 + $0x18] sm:$0xff]  ;;  %v133_v28 = vld [vmem:[%s446_s4 + $0x10] sm:$0xff] }
   0xf   :  { %262 = vmatpush.msra.mxu3 %v46_v4  ;;  %152 = vperm.xlu2 %275, %v134_v20   ;;  %v127_v34 = vld [vmem:[#allocation3] sm:$0xff]  ;;  %v128_v35 = vld [vmem:[#allocation3 + $0x8] sm:$0xff]  ;;  %v202_v36 = vld [vmem:[#allocation2] sm:$0x1] }
  0x10   :  { %108 = vmatpush.msra.mxu0 %v46_v4  ;;  %v129_v37 = vld [vmem:[#allocation3 + $0x10] sm:$0xff]  ;;  %v130_v38 = vld [vmem:[#allocation3 + $0x18] sm:$0xff] }
  0x11   :  { %263 = vmatpush.msra.mxu3 %v45_v7  ;;  %v201_v55 = vld [vmem:[%s447_s5] sm:$0x1] }
  0x12   :  { %252 = vmatmul.msk.f32.vlgmr.msra.gmra.mxu3 %vm77_vm1, %v50_v8  ;;  %109 = vmatpush.msra.mxu0 %v45_v7 }
  0x13   :  { %251 = vmatmul.msk.f32.vlgmr.msra.gmra.mxu0 %vm77_vm1, %v49_v9 }
  0x14   :  { %69 = vperm.xlu0 %273, %v55_v10  }
  0x15   :  { %59 = vperm.xlu1 %274, %v53_v11  }
  0x17   :  { %147 = vperm.xlu2 %275, %v133_v28  }
  0x1a   :  { %253 = vmatmul.msk.f32.gmra.mxu3 %vm77_vm1, %v51_v12 }
  0x1c   :  { %142 = vperm.xlu0 %273, %v132_v13  }
  0x1d   :  { %137 = vperm.xlu1 %274, %v131_v14  }
  0x1f   :  { %205 = vperm.xlu2 %275, %v202_v36  }
  0x22   :  { %254 = vmatmul.msk.f32.gmra.mxu3 %vm77_vm1, %v52_v15 }
  0x69   :  { %v153_v40 = vpop.permute.xlu2 %152 }
  0x71   :  { %v148_v42 = vpop.permute.xlu2 %147 }
  0x79   :  { %v206_v56 = vpop.permute.xlu2 %205 }
  0x7a   :  { %v208_v57 = vperm.slane %v206_v56, 0 }
  0x7e   :  { %v75_v17 = vpop.permute.xlu0 %74 }
  0x7f   :  { %v65_v19 = vpop.permute.xlu1 %64 }
  0x86   :  { %v70_v21 = vpop.permute.xlu0 %69 }
  0x87   :  { %v60_v29 = vpop.permute.xlu1 %59 }
  0x8e   :  { %v143_v46 = vpop.permute.xlu0 %142 }
  0x8f   :  { %v138_v50 = vpop.permute.xlu1 %137 }
  0x90   :  { %v111_v25 = vpop.f32.mrf.mxu0 }
  0x91   :  { %v112_v31 = vadd.f32 %v111_v25, %v60_v29 }
  0x93   :  { %v123_v33 = vmax.f32 %v112_v31, 0.0 }
  0x95   :  { %v114_v16 = vpop.f32.mrf.mxu3 }
  0x96   :  { %v115_v26 = vadd.f32 %v114_v16, %v65_v19 }
  0x98   :  { %v124_v32 = vmax.f32 %v115_v26, 0.0 }
  0x9d   :  { %v117_v18 = vpop.f32.mrf.mxu3 }
  0x9e   :  { %v118_v23 = vadd.f32 %v117_v18, %v70_v21 }
  0xa0   :  { %v125_v30 = vmax.f32 %v118_v23, 0.0 }
  0xa5   :  { %v120_v22 = vpop.f32.mrf.mxu3 }
  0xa6   :  { %v121_v24 = vadd.f32 %v120_v22, %v75_v17 }
  0xa8   :  { %v126_v27 = vmax.f32 %v121_v24, 0.0 }
  0xaa   :  { %180 = vmatpush.msrb.mxu0 %v126_v27  ;;  %264 = vmatpush.msra.mxu1 %v126_v27 }
  0xac   :  { %181 = vmatpush.msrb.mxu0 %v125_v30  ;;  %265 = vmatpush.msra.mxu1 %v125_v30 }
  0xae   :  { %182 = vmatpush.msrb.mxu0 %v124_v32  ;;  %266 = vmatpush.msra.mxu1 %v124_v32 }
  0xb0   :  { %183 = vmatpush.msrb.mxu0 %v123_v33  ;;  %267 = vmatpush.msra.mxu1 %v123_v33 }
  0xb1   :  { %255 = vmatmul.msk.f32.vlgmr.msrb.gmra.mxu0 %vm155_vm2, %v127_v34  ;;  %256 = vmatmul.msk.f32.vlgmr.msra.gmra.mxu1 %vm155_vm2, %v128_v35 }
  0xb9   :  { %257 = vmatmul.msk.f32.gmra.mxu1 %vm155_vm2, %v129_v37 }
  0xc1   :  { %258 = vmatmul.msk.f32.gmra.mxu1 %vm155_vm2, %v130_v38 }
 0x12e   :  { %v188_v39 = vpop.f32.mrf.mxu1  ;;  %v185_v47 = vpop.f32.mrf.mxu0 }
 0x12f   :  { %v189_v48 = vadd.f32 %v188_v39, %v143_v46  ;;  %v186_v51 = vadd.f32 %v185_v47, %v138_v50 }
 0x131   :  { %v198_v53 = vmax.f32 %v189_v48, 0.0  ;;  %v197_v54 = vmax.f32 %v186_v51, 0.0 }
 0x136   :  { %v191_v41 = vpop.f32.mrf.mxu1 }
 0x137   :  { %v192_v44 = vadd.f32 %v191_v41, %v148_v42 }
 0x139   :  { %v199_v52 = vmax.f32 %v192_v44, 0.0 }
 0x13e   :  { %v194_v43 = vpop.f32.mrf.mxu1 }
 0x13f   :  { %v195_v45 = vadd.f32 %v194_v43, %v153_v40 }
 0x141   :  { %v200_v49 = vmax.f32 %v195_v45, 0.0 }
 0x143   :  { %224 = vmatpush.msra.mxu2 %v200_v49 }
 0x145   :  { %225 = vmatpush.msra.mxu2 %v199_v52 }
 0x147   :  { %226 = vmatpush.msra.mxu2 %v198_v53 }
 0x149   :  { %227 = vmatpush.msra.mxu2 %v197_v54 }
 0x14a   :  { %259 = vmatmul.msk.f32.vlgmr.msra.gmra.mxu2 %vm155_vm2, %v201_v55 }
 0x1cd   :  { %v229_v58 = vpop.f32.mrf.mxu2 }
 0x1ce   :  { %v230_v59 = vadd.f32 %v229_v58, %v208_v57 }
 0x1d0   :  { %232 = vst [vmem:[#allocation6] sm:$0x1] %v230_v59 }
 0x1d1   :  { %243 = dma.vmem_to_hbm [thread:$0]  %s239_s14, 16, %s241_s17, [#allocation5]  }
 0x1d2   :  { %326 = dma.done.wait [#allocation5], 16  }
 0x1d3   :  { %327 = vsyncadd [#allocation5], 4294967280 }
 0x1d4   :  { %248 = vsyncpa [#allocation4], 1 }
 0x1d5   :  { %249 = vsyncpa [#allocation5], 1 }

</bundles_post_ra>
